<compile_context>
chip_gen: v7x
topology: tpu7x:2x2x1
jax: 0.10.0
libtpu: 0.0.40
codegen_flags: <defaults>
</compile_context>

<pallas_src>
import functools

import jax
import jax.numpy as jnp
from jax import lax
from jax.experimental import pallas as pl
from jax.experimental.pallas import tpu as pltpu


def _round_up(x, m):
    return ((x + m - 1) // m) * m


def _gcn_kernel(occ_ref, adj_ref, xhi_ref, xlo_ref, *rest,
                apply_linear, x_resident, tk, nk):
    """One (dest tile i, source tile k) grid step.

    occ_ref : SMEM int32[n_i*n_k]  tile occupancy, index i*nk + k.
    adj_ref : (TK, TM) bf16  block of the UNtransposed adjacency adj[u, v].
    xhi/xlo : bf16 feature hi/lo split; full (N_pad, W) if resident,
              else the (TK, W) source tile.
    rest    : (wt_ref?, b_ref, o_ref, acc_ref)
    """
    if apply_linear:
        wt_ref, b_ref, o_ref, acc_ref = rest
    else:
        b_ref, o_ref, acc_ref = rest

    i = pl.program_id(0)
    k = pl.program_id(1)

    @pl.when(k == 0)
    def _():
        acc_ref[...] = jnp.zeros_like(acc_ref)

    # Skip the MXU work for all-zero adjacency tiles (block-sparse graphs).
    @pl.when(occ_ref[i * nk + k] != 0)
    def _():
        if x_resident:
            s = pl.multiple_of(k * tk, tk)
            xhi = xhi_ref[pl.ds(s, tk), :]
            xlo = xlo_ref[pl.ds(s, tk), :]
        else:
            xhi = xhi_ref[...]
            xlo = xlo_ref[...]
        a = adj_ref[...]                      # bf16, stays bf16 for the MXU
        dims = (((0,), (0,)), ((), ()))       # contract the source axis of both
        # h[v, :] += sum_u adj[u, v] * x[u, :]  ==  adj^T @ x, no transpose in HBM.
        acc_ref[...] += (
            lax.dot_general(a, xhi, dimension_numbers=dims,
                            preferred_element_type=jnp.float32)
            + lax.dot_general(a, xlo, dimension_numbers=dims,
                              preferred_element_type=jnp.float32)
        )

    # Epilogue: finish once per dest tile.
    @pl.when(k == nk - 1)
    def _():
        acc = acc_ref[...]
        if apply_linear:
            out = jnp.dot(acc, wt_ref[...],
                          preferred_element_type=jnp.float32) + b_ref[...]
        else:
            out = acc + b_ref[...]
        o_ref[...] = out.astype(o_ref.dtype)


def gcn_layer(adj, feature, weight, bias, *,
              tile_cap=2048,
              vmem_budget_bytes=26 << 20,        # stay under v7x's 32 MiB scoped VMEM
              x_resident_budget_bytes=8 << 20):
    """GCN layer forward: (adj^T @ feature) @ weight^T + bias.

    adj     : [N, N]    dense adjacency, adj[u, v] = 1 iff edge u -> v.
    feature : [N, in_feats]
    weight  : [out_feats, in_feats]   (PyTorch nn.Linear layout)
    bias    : [out_feats]
    """
    N, in_feats = feature.shape
    out_feats = weight.shape[0]

    f32, bf16 = jnp.float32, jnp.bfloat16
    Dp = _round_up(in_feats, 128)
    Fp = _round_up(out_feats, 128)

    # Apply the Linear BEFORE the N^2 aggregation when it shrinks the streamed
    # feature width / accumulator (gated on padded widths).
    pre_project = Fp < Dp
    W_feat = Fp if pre_project else Dp

    # ---- node tile (dest == source) under the VMEM budget -------------------
    T = min(tile_cap, _round_up(N, 128))

    def _est(t):
        npad = _round_up(N, t)
        x_res = (npad * W_feat * 2 * 2) <= x_resident_budget_bytes
        adj_b = 2 * t * t * 2                                    # bf16, double-buffered
        x_b = npad * W_feat * 2 * 2 if x_res else 2 * 2 * t * W_feat * 2
        out_b = 2 * t * Fp * 4
        acc_b = t * W_feat * 4
        w_b = (0 if pre_project else Dp * Fp * 4) + Fp * 4
        return adj_b + x_b + out_b + acc_b + w_b, x_res

    est, x_resident = _est(T)
    while est > vmem_budget_bytes and T > 128:
        T = max(128, (T // 2) // 128 * 128)
        est, x_resident = _est(T)

    N_pad = _round_up(N, T)
    n_i = N_pad // T
    n_k = N_pad // T

    # ---- operand prep (graph constants: hoist out of per-call path in a
    # multi-layer / training setting) -----------------------------------------
    adj_p = jnp.zeros((N_pad, N_pad), bf16).at[:N, :N].set(adj.astype(bf16))

    xf = feature.astype(f32)
    if pre_project:
        xf = jnp.dot(xf, weight.T.astype(f32), precision='highest')
    width = xf.shape[1]
    x_hi = xf.astype(bf16)
    x_lo = (xf - x_hi.astype(f32)).astype(bf16)
    x_hi_p = jnp.zeros((N_pad, W_feat), bf16).at[:N, :width].set(x_hi)
    x_lo_p = jnp.zeros((N_pad, W_feat), bf16).at[:N, :width].set(x_lo)

    b_p = jnp.zeros((1, Fp), f32).at[0, :out_feats].set(bias.astype(f32))

    # Tile occupancy: occ_flat[i * n_k + k] != 0 iff adjacency block
    # (source tile k, dest tile i) has at least one edge.
    occ = jnp.any(adj_p.reshape(n_k, T, n_i, T) != 0, axis=(1, 3))   # (n_k, n_i)
    occ_flat = occ.T.reshape(-1).astype(jnp.int32)                    # (i, k) order

    inputs = [occ_flat, adj_p, x_hi_p, x_lo_p]
    in_specs = [
        # adjacency streamed UNtransposed: block (source TK, dest TM) = (k, i)
        pl.BlockSpec((T, T), lambda i, k, occ: (k, i)),
    ]
    if x_resident:
        x_spec = pl.BlockSpec((N_pad, W_feat), lambda i, k, occ: (0, 0))
    else:
        x_spec = pl.BlockSpec((T, W_feat), lambda i, k, occ: (k, 0))
    in_specs += [x_spec, x_spec]

    if not pre_project:
        wt_p = jnp.zeros((Dp, Fp), f32).at[:in_feats, :out_feats].set(
            weight.T.astype(f32))
        inputs.append(wt_p)
        in_specs.append(pl.BlockSpec((Dp, Fp), lambda i, k, occ: (0, 0)))
    inputs.append(b_p)
    in_specs.append(pl.BlockSpec((1, Fp), lambda i, k, occ: (0, 0)))

    kernel = functools.partial(
        _gcn_kernel,
        apply_linear=not pre_project,
        x_resident=x_resident,
        tk=T,
        nk=n_k,
    )

    # >= v5e's 16 MiB scoped default, <= v7x's 64 MiB physical VMEM.
    vmem_limit = int(min(max(est * 5 // 4 + (4 << 20), 32 << 20), 64 << 20))

    out_p = pl.pallas_call(
        kernel,
        out_shape=jax.ShapeDtypeStruct((N_pad, Fp), f32),
        grid_spec=pltpu.PrefetchScalarGridSpec(
            num_scalar_prefetch=1,
            grid=(n_i, n_k),                        # (dest tile, source tile)
            in_specs=in_specs,
            out_specs=pl.BlockSpec((T, Fp), lambda i, k, occ: (i, 0)),
            scratch_shapes=[pltpu.VMEM((T, W_feat), f32)],
        ),
        compiler_params=pltpu.CompilerParams(
            dimension_semantics=("parallel", "arbitrary"),
            vmem_limit_bytes=vmem_limit,
        ),
    )(*inputs)

    return out_p[:N, :out_feats].astype(feature.dtype)


if __name__ == "__main__":
    key = jax.random.PRNGKey(0)
    k_adj, k_x, k_w, k_b = jax.random.split(key, 4)

    N = 8            # number of graph nodes
    in_feats = 16
    out_feats = 32

    # Deterministic synthetic graph (dense adjacency, no self loops) + inputs.
    # TODO(synk): DGL's sparse CSR message passing is modeled as a dense
    # (block-sparse-skipped) adjacency matmul; a true CSR gather/scatter
    # kernel is not implemented.
    adj = (jax.random.uniform(k_adj, (N, N)) > 0.5).astype(jnp.float32)
    adj = adj * (1.0 - jnp.eye(N, dtype=jnp.float32))
    feature = jax.random.normal(k_x, (N, in_feats), dtype=jnp.float32)

    # Deterministic Linear params (PyTorch layout: weight [out_feats, in_feats]).
    bound = 1.0 / (in_feats ** 0.5)
    weight = jax.random.uniform(k_w, (out_feats, in_feats),
                                minval=-bound, maxval=bound, dtype=jnp.float32)
    bias = jax.random.uniform(k_b, (out_feats,),
                              minval=-bound, maxval=bound, dtype=jnp.float32)

    res = gcn_layer(adj, feature, weight, bias)
    jax.block_until_ready(res)

    # Pure-JAX reference of the same semantics.
    ref_h = jnp.einsum('uv,ud->vd', adj, feature, precision='highest')
    ref = jnp.dot(ref_h, weight.T, precision='highest') + bias

    assert res.shape == (N, out_feats)
    err = float(jnp.max(jnp.abs(res - ref)))
    # Tolerance deliberately 5e-4: bf16 hi/lo split of x leaves ~2^-17 relative
    # aggregation error (adj is exact in bf16 for 0/1 edges).
    assert jnp.allclose(res, ref, atol=5e-4, rtol=5e-4), err

    print("KERNEL_OK")
</pallas_src>

<mosaic_0001>
module attributes {stable_mosaic.version = 11 : i64} {
  func.func @_gcn_kernel(%arg0: i32, %arg1: i32, %arg2: memref<1xi32, #tpu.memory_space<smem>>, %arg3: memref<128x128xbf16, #tpu.memory_space<vmem>>, %arg4: memref<128x128xbf16, #tpu.memory_space<vmem>>, %arg5: memref<128x128xbf16, #tpu.memory_space<vmem>>, %arg6: memref<128x128xf32, #tpu.memory_space<vmem>>, %arg7: memref<1x128xf32, #tpu.memory_space<vmem>>, %arg8: memref<128x128xf32, #tpu.memory_space<vmem>>, %arg9: memref<128x128xf32, #tpu.memory_space<vmem>>) attributes {dimension_semantics = [#tpu.dimension_semantics<parallel>, #tpu.dimension_semantics<arbitrary>], iteration_bounds = array<i64: 1, 1>, scalar_prefetch = 1 : i64, scratch_operands = 1 : i64, tpu.core_type = #tpu.core_type<tc>, window_params = [{transform_indices = @transform_0, window_bounds = array<i64: 128, 128>}, {pipeline_mode = #tpu.pipeline_mode<synchronous>, transform_indices = @transform_1, window_bounds = array<i64: 128, 128>}, {pipeline_mode = #tpu.pipeline_mode<synchronous>, transform_indices = @transform_2, window_bounds = array<i64: 128, 128>}, {pipeline_mode = #tpu.pipeline_mode<synchronous>, transform_indices = @transform_3, window_bounds = array<i64: 128, 128>}, {pipeline_mode = #tpu.pipeline_mode<synchronous>, transform_indices = @transform_4, window_bounds = array<i64: 1, 128>}, {transform_indices = @transform_5, window_bounds = array<i64: 128, 128>}]} {
    %c0_i32 = arith.constant 0 : i32
    %0 = arith.cmpi eq, %arg1, %c0_i32 : i32
    %1 = arith.extui %0 : i1 to i32
    %c0_i32_0 = arith.constant 0 : i32
    %2 = arith.cmpi ne, %1, %c0_i32_0 : i32
    scf.if %2 {
      %cst = arith.constant 0.000000e+00 : f32
      %13 = vector.broadcast %cst : f32 to vector<128x128xf32>
      %c0 = arith.constant 0 : index
      %c0_5 = arith.constant 0 : index
      %14 = vector.load %arg9[%c0, %c0_5] : memref<128x128xf32, #tpu.memory_space<vmem>>, vector<128x128xf32>
      tpu.vector_store %arg9[%c0, %c0_5], %13 {strides = array<i32>} : memref<128x128xf32, #tpu.memory_space<vmem>>, vector<128x128xf32>,
    } else {
    }
    %c1_i32 = arith.constant 1 : i32
    %3 = arith.muli %arg0, %c1_i32 : i32
    %4 = arith.addi %3, %arg1 : i32
    %5 = arith.index_cast %4 : i32 to index
    %6 = memref.load %arg2[%5] : memref<1xi32, #tpu.memory_space<smem>>
    %c0_i32_1 = arith.constant 0 : i32
    %7 = arith.cmpi ne, %6, %c0_i32_1 : i32
    %8 = arith.extui %7 : i1 to i32
    %c0_i32_2 = arith.constant 0 : i32
    %9 = arith.cmpi ne, %8, %c0_i32_2 : i32
    scf.if %9 {
      %c128_i32 = arith.constant 128 : i32
      %13 = arith.muli %arg1, %c128_i32 : i32
      %14 = tpu.assume_multiple %13, 128 : i32
      %15 = arith.index_cast %14 : i32 to index
      %c0 = arith.constant 0 : index
      %16 = vector.load %arg4[%15, %c0] : memref<128x128xbf16, #tpu.memory_space<vmem>>, vector<128x128xbf16>
      %17 = arith.index_cast %14 : i32 to index
      %c0_5 = arith.constant 0 : index
      %18 = vector.load %arg5[%17, %c0_5] : memref<128x128xbf16, #tpu.memory_space<vmem>>, vector<128x128xbf16>
      %c0_6 = arith.constant 0 : index
      %c0_7 = arith.constant 0 : index
      %19 = vector.load %arg3[%c0_6, %c0_7] : memref<128x128xbf16, #tpu.memory_space<vmem>>, vector<128x128xbf16>
      %c0_8 = arith.constant 0 : index
      %c0_9 = arith.constant 0 : index
      %20 = vector.load %arg9[%c0_8, %c0_9] : memref<128x128xf32, #tpu.memory_space<vmem>>, vector<128x128xf32>
      %cst = arith.constant dense<0.000000e+00> : vector<128x128xf32>
      %21 = tpu.matmul %19, %16, %cst {dimension_numbers = #tpu.dot_dimension_numbers<[0], [0], [1], [1], [0, 1, 1, 1], [], []>} : vector<128x128xbf16>, vector<128x128xbf16>, vector<128x128xf32> -> vector<128x128xf32>
      %cst_10 = arith.constant dense<0.000000e+00> : vector<128x128xf32>
      %22 = tpu.matmul %19, %18, %cst_10 {dimension_numbers = #tpu.dot_dimension_numbers<[0], [0], [1], [1], [0, 1, 1, 1], [], []>} : vector<128x128xbf16>, vector<128x128xbf16>, vector<128x128xf32> -> vector<128x128xf32>
      %23 = arith.addf %21, %22 : vector<128x128xf32>
      %24 = arith.addf %20, %23 : vector<128x128xf32>
      %c0_11 = arith.constant 0 : index
      %c0_12 = arith.constant 0 : index
      %25 = vector.load %arg9[%c0_11, %c0_12] : memref<128x128xf32, #tpu.memory_space<vmem>>, vector<128x128xf32>
      tpu.vector_store %arg9[%c0_11, %c0_12], %24 {strides = array<i32>} : memref<128x128xf32, #tpu.memory_space<vmem>>, vector<128x128xf32>,
    } else {
    }
    %c0_i32_3 = arith.constant 0 : i32
    %10 = arith.cmpi eq, %arg1, %c0_i32_3 : i32
    %11 = arith.extui %10 : i1 to i32
    %c0_i32_4 = arith.constant 0 : i32
    %12 = arith.cmpi ne, %11, %c0_i32_4 : i32
    scf.if %12 {
      %c0 = arith.constant 0 : index
      %c0_5 = arith.constant 0 : index
      %13 = vector.load %arg9[%c0, %c0_5] : memref<128x128xf32, #tpu.memory_space<vmem>>, vector<128x128xf32>
      %c0_6 = arith.constant 0 : index
      %c0_7 = arith.constant 0 : index
      %14 = vector.load %arg6[%c0_6, %c0_7] : memref<128x128xf32, #tpu.memory_space<vmem>>, vector<128x128xf32>
      %cst = arith.constant dense<0.000000e+00> : vector<128x128xf32>
      %15 = tpu.matmul %13, %14, %cst {dimension_numbers = #tpu.dot_dimension_numbers<[1], [0], [0], [1], [0, 0, 1, 1], [], []>} : vector<128x128xf32>, vector<128x128xf32>, vector<128x128xf32> -> vector<128x128xf32>
      %c0_8 = arith.constant 0 : index
      %c0_9 = arith.constant 0 : index
      %16 = vector.load %arg7[%c0_8, %c0_9] : memref<1x128xf32, #tpu.memory_space<vmem>>, vector<1x128xf32>
      %17 = vector.broadcast %16 : vector<1x128xf32> to vector<128x128xf32>
      %18 = arith.addf %15, %17 : vector<128x128xf32>
      %c0_10 = arith.constant 0 : index
      %c0_11 = arith.constant 0 : index
      %19 = vector.load %arg8[%c0_10, %c0_11] : memref<128x128xf32, #tpu.memory_space<vmem>>, vector<128x128xf32>
      tpu.vector_store %arg8[%c0_10, %c0_11], %18 {strides = array<i32>} : memref<128x128xf32, #tpu.memory_space<vmem>>, vector<128x128xf32>,
    } else {
    }
    return
  }
  func.func @transform_0(%arg0: i32, %arg1: i32, %arg2: memref<1xi32, #tpu.memory_space<smem>>) -> (i32, i32) {
    %c0_i32 = arith.constant 0 : i32
    return %arg1, %arg0 : i32, i32
  }
  func.func @transform_1(%arg0: i32, %arg1: i32, %arg2: memref<1xi32, #tpu.memory_space<smem>>) -> (i32, i32) {
    %c0_i32 = arith.constant 0 : i32
    %c0_i32_0 = arith.constant 0 : i32
    %c0_i32_1 = arith.constant 0 : i32
    return %c0_i32, %c0_i32_0 : i32, i32
  }
  func.func @transform_2(%arg0: i32, %arg1: i32, %arg2: memref<1xi32, #tpu.memory_space<smem>>) -> (i32, i32) {
    %c0_i32 = arith.constant 0 : i32
    %c0_i32_0 = arith.constant 0 : i32
    %c0_i32_1 = arith.constant 0 : i32
    return %c0_i32, %c0_i32_0 : i32, i32
  }
  func.func @transform_3(%arg0: i32, %arg1: i32, %arg2: memref<1xi32, #tpu.memory_space<smem>>) -> (i32, i32) {
    %c0_i32 = arith.constant 0 : i32
    %c0_i32_0 = arith.constant 0 : i32
    %c0_i32_1 = arith.constant 0 : i32
    return %c0_i32, %c0_i32_0 : i32, i32
  }
  func.func @transform_4(%arg0: i32, %arg1: i32, %arg2: memref<1xi32, #tpu.memory_space<smem>>) -> (i32, i32) {
    %c0_i32 = arith.constant 0 : i32
    %c0_i32_0 = arith.constant 0 : i32
    %c0_i32_1 = arith.constant 0 : i32
    return %c0_i32, %c0_i32_0 : i32, i32
  }
  func.func @transform_5(%arg0: i32, %arg1: i32, %arg2: memref<1xi32, #tpu.memory_space<smem>>) -> (i32, i32) {
    %c0_i32 = arith.constant 0 : i32
    %c0_i32_0 = arith.constant 0 : i32
    return %arg0, %c0_i32 : i32, i32
  }
}

</mosaic_0001>

<bundles_post_ra>
// kernel: tpu_custom_call.1
= control target key start
LH: loop header
LB: loop body
LE: loop exit
PB: predicated region body
PF: predicated region fallthrough
CT: control target
= control target key end

     0   :  { %12 = vsyncpa [#allocation6], 0  ;;  %s1354_s0 = inlined_call_operand.<no memory space> [shape: s32[1], index: 0, kind: input, shape index: {}]   ;;  %s1355_s1 = inlined_call_operand.hbm [shape: bf16[128,128], index: 1, kind: input, shape index: {}]   ;;  %s1356_s2 = inlined_call_operand.hbm [shape: bf16[128,128], index: 2, kind: input, shape index: {}]   ;;  %s1357_s3 = inlined_call_operand.hbm [shape: bf16[128,128], index: 3, kind: input, shape index: {}]   ;;  %s1358_s4 = inlined_call_operand.hbm [shape: f32[128,128], index: 4, kind: input, shape index: {}]   ;;  %s1359_s5 = inlined_call_operand.vmem [shape: f32[1,128], index: 5, kind: input, shape index: {}]   ;;  %s1360_s6 = inlined_call_operand.hbm [shape: f32[128,128], index: 6, kind: output, shape index: {}]  }
   0x1   :  { %13 = vsyncpa [#allocation9], 0 }
   0x2   :  { %14 = vsyncpa [#allocation12], 0 }
   0x3   :  { %15 = vsyncpa [#allocation7], 0  ;;  %s1214_s21 = smov [#allocation8]   ;;  %s1215_s23 = smov [#allocation5]  }
   0x4   :  { %s33_s22 = sshll.u32 %s1214_s21, 4  ;;  %s21_s24 = sshll.u32 %s1215_s23, 4  ;;  %s34_s22 = int_to_ptr.vmem [resolvable:$true] %s33_s22  ;;  %s1259_s24 = int_to_ptr.vmem [resolvable:$true] %s21_s24 }
   0x5   :  { %s1096_s27 = scalar_lea.hbm %s1356_s2, 1024 }
   0x6   :  { %p1097_p0 = scmp.ne.s32.totalorder %s1356_s2, %s1096_s27  ;;  %p1100_p1 = scmp.lt.u32.totalorder %s1096_s27, %s1356_s2 }
   0x8   :  { %p1102_p2 = pnand %p1100_p1, %p1097_p0 }
   0xa   :  { %1105 = shalt.err (!%p1102_p2)
}
   0xb   :  { %s1106_s8 = scalar_lea.vmem %s34_s22, 1024  ;;  %p1111_p4 = scmp.lt.s32.totalorder %s34_s22, %s34_s22 }
   0xc   :  { %p1107_p3 = scmp.ne.s32.totalorder %s34_s22, %s1106_s8  ;;  %p1112_p5 = scmp.lt.s32.totalorder %s1106_s8, %s1106_s8 }
   0xe   :  { %p1113_p6 = por %p1112_p5, %p1111_p4 }
  0x10   :  { %p1114_p7 = pnand %p1113_p6, %p1107_p3 }
  0x12   :  { %1117 = shalt.err (!%p1114_p7)
}
  0x13   :  { %s1216_s9 = smov 64   ;;  %s1217_s10 = smov 4  }
  0x14   :  { %39 = dma.hbm_to_vmem [thread:$0]  %s1356_s2, 1024, %s34_s22, [#allocation9], %s1216_s9, %s1216_s9, %s1217_s10  }
  0x15   :  { %s1118_s15 = scalar_lea.hbm %s1355_s1, 1024 }
  0x16   :  { %p1119_p8 = scmp.ne.s32.totalorder %s1355_s1, %s1118_s15  ;;  %p1122_p9 = scmp.lt.u32.totalorder %s1118_s15, %s1355_s1 }
  0x18   :  { %p1124_p10 = pnand %p1122_p9, %p1119_p8 }
  0x1a   :  { %1127 = shalt.err (!%p1124_p10)
}
  0x1b   :  { %s1128_s20 = scalar_lea.vmem %s1259_s24, 1024  ;;  %p1133_p12 = scmp.lt.s32.totalorder %s1259_s24, %s1259_s24 }
  0x1c   :  { %p1129_p11 = scmp.ne.s32.totalorder %s1259_s24, %s1128_s20  ;;  %p1134_p13 = scmp.lt.s32.totalorder %s1128_s20, %s1128_s20 }
  0x1e   :  { %p1135_p0 = por %p1134_p13, %p1133_p12 }
  0x20   :  { %p1136_p1 = pnand %p1135_p0, %p1129_p11 }
  0x22   :  { %1139 = shalt.err (!%p1136_p1)
}
  0x23   :  { %27 = dma.hbm_to_vmem [thread:$0]  %s1355_s1, 1024, %s1259_s24, [#allocation6], %s1216_s9, %s1216_s9, %s1217_s10  }
  0x24   :  { %s1218_s22 = smov [#allocation10]   ;;  %s1219_s25 = smov [#allocation11]  }
  0x25   :  { %s45_s23 = sshll.u32 %s1218_s22, 4  ;;  %s57_s26 = sshll.u32 %s1219_s25, 4  ;;  %s46_s23 = int_to_ptr.vmem [resolvable:$true] %s45_s23  ;;  %s1296_s26 = int_to_ptr.vmem [resolvable:$true] %s57_s26 }
  0x26   :  { %s1140_s29 = scalar_lea.hbm %s1357_s3, 1024 }
  0x27   :  { %p1141_p2 = scmp.ne.s32.totalorder %s1357_s3, %s1140_s29  ;;  %p1144_p3 = scmp.lt.u32.totalorder %s1140_s29, %s1357_s3 }
  0x29   :  { %p1146_p4 = pnand %p1144_p3, %p1141_p2 }
  0x2b   :  { %1149 = shalt.err (!%p1146_p4)
}
  0x2c   :  { %s1150_s1 = scalar_lea.vmem %s46_s23, 1024  ;;  %p1155_p6 = scmp.lt.s32.totalorder %s46_s23, %s46_s23 }
  0x2d   :  { %p1151_p5 = scmp.ne.s32.totalorder %s46_s23, %s1150_s1  ;;  %p1156_p7 = scmp.lt.s32.totalorder %s1150_s1, %s1150_s1 }
  0x2f   :  { %p1157_p8 = por %p1156_p7, %p1155_p6 }
  0x31   :  { %p1158_p9 = pnand %p1157_p8, %p1151_p5 }
  0x33   :  { %1161 = shalt.err (!%p1158_p9)
}
  0x34   :  { %51 = dma.hbm_to_vmem [thread:$0]  %s1357_s3, 1024, %s46_s23, [#allocation9], %s1216_s9, %s1216_s9, %s1217_s10  }
  0x35   :  { %s1162_s15 = scalar_lea.hbm %s1358_s4, 2048 }
  0x36   :  { %p1163_p10 = scmp.ne.s32.totalorder %s1358_s4, %s1162_s15  ;;  %p1166_p11 = scmp.lt.u32.totalorder %s1162_s15, %s1358_s4 }
  0x38   :  { %p1168_p12 = pnand %p1166_p11, %p1163_p10 }
  0x3a   :  { %1171 = shalt.err (!%p1168_p12)
}
  0x3b   :  { %s1172_s20 = scalar_lea.vmem %s1296_s26, 2048  ;;  %p1177_p0 = scmp.lt.s32.totalorder %s1296_s26, %s1296_s26 }
  0x3c   :  { %p1173_p13 = scmp.ne.s32.totalorder %s1296_s26, %s1172_s20  ;;  %p1178_p1 = scmp.lt.s32.totalorder %s1172_s20, %s1172_s20 }
  0x3e   :  { %p1179_p2 = por %p1178_p1, %p1177_p0 }
  0x40   :  { %p1180_p3 = pnand %p1179_p2, %p1173_p13 }
  0x42   :  { %1183 = shalt.err (!%p1180_p3)
}
  0x43   :  { %s1220_s3 = smov 128   ;;  %s1221_s9 = smov 8  }
  0x44   :  { %63 = dma.hbm_to_vmem [thread:$0]  %s1358_s4, 2048, %s1296_s26, [#allocation12], %s1220_s3, %s1220_s3, %s1221_s9  }
  0x45   :  { %1206 = dma.done.wait [#allocation6], 1024  }
  0x46   :  { %1207 = vsyncadd [#allocation6], 4294966272 }
  0x47   :  { %1208 = dma.done.wait [#allocation9], 2048  }
  0x48   :  { %1209 = vsyncadd [#allocation9], 4294965248 }
  0x49   :  { %1210 = dma.done.wait [#allocation12], 2048  }
  0x4a   :  { %1211 = vsyncadd [#allocation12], 4294965248  ;;  %v1222_v0 = vmov 0.0   ;;  %p788_p4 = scmp.eq.s32.totalorder %s1354_s0, 0 }
  0x4b   :  { %83 = vst [vmem:[#allocation2] sm:$0xff] %v1222_v0  ;;  %84 = vst [vmem:[#allocation2 + $0x8] sm:$0xff] %v1222_v0  ;;  %v1072_v1 = vld [vmem:[#allocation5] sm:$0xff] (!%p788_p4)   ;;  %v1073_v2 = vld [vmem:[#allocation5 + $0x8] sm:$0xff] (!%p788_p4)  }
  0x4c   :  { %85 = vst [vmem:[#allocation2 + $0x10] sm:$0xff] %v1222_v0  ;;  %86 = vst [vmem:[#allocation2 + $0x18] sm:$0xff] %v1222_v0  ;;  %104 = sbr.rel (%p788_p4) target bundleno = 427 (0x1ab), region = 45  ;;  %224 = vxpose.xlu0.c.b16.start [1/8] (!%p788_p4), %v1072_v1, 128  ;;  %v1074_v3 = vld [vmem:[#allocation5 + $0x10] sm:$0xff] (!%p788_p4)   ;;  %v1075_v4 = vld [vmem:[#allocation5 + $0x18] sm:$0xff] (!%p788_p4)  }
  0x4d   :  { %87 = vst [vmem:[#allocation2 + $0x20] sm:$0xff] %v1222_v0  ;;  %88 = vst [vmem:[#allocation2 + $0x28] sm:$0xff] %v1222_v0  ;;  %v1080_v5 = vld [vmem:[#allocation10] sm:$0xff] (!%p788_p4)   ;;  %v1082_v7 = vld [vmem:[#allocation10 + $0x8] sm:$0xff] (!%p788_p4)  }
  0x4e   :  { %89 = vst [vmem:[#allocation2 + $0x30] sm:$0xff] %v1222_v0  ;;  %90 = vst [vmem:[#allocation2 + $0x38] sm:$0xff] %v1222_v0  ;;  %v1081_v6 = vld [vmem:[#allocation8] sm:$0xff] (!%p788_p4)   ;;  %878 = vmatprep.subr.bf16.mxu1 (!%p788_p4), %v1080_v5  ;;  %v1083_v8 = vld [vmem:[#allocation8 + $0x8] sm:$0xff] (!%p788_p4)  }
  0x4f   :  { %91 = vst [vmem:[#allocation2 + $0x40] sm:$0xff] %v1222_v0  ;;  %92 = vst [vmem:[#allocation2 + $0x48] sm:$0xff] %v1222_v0  ;;  %910 = vmatprep.subr.bf16.mxu0 (!%p788_p4), %v1081_v6  ;;  %879 = vmatpush3.bf16.msra.mxu1 (!%p788_p4), %v1080_v5  ;;  %v1084_v9 = vld [vmem:[#allocation10 + $0x10] sm:$0xff] (!%p788_p4)   ;;  %v1076_v11 = vld [vmem:[#allocation5 + $0x20] sm:$0xff] (!%p788_p4)  }
  0x50   :  { %93 = vst [vmem:[#allocation2 + $0x50] sm:$0xff] %v1222_v0  ;;  %94 = vst [vmem:[#allocation2 + $0x58] sm:$0xff] %v1222_v0  ;;  %225 = vxpose.xlu0.c.b16.cont [2/8] (!%p788_p4), %v1073_v2, 128  ;;  %911 = vmatpush3.bf16.msra.mxu0 (!%p788_p4), %v1081_v6  ;;  %v1085_v10 = vld [vmem:[#allocation8 + $0x10] sm:$0xff] (!%p788_p4)   ;;  %v1086_v12 = vld [vmem:[#allocation10 + $0x18] sm:$0xff] (!%p788_p4)  }
  0x51   :  { %95 = vst [vmem:[#allocation2 + $0x60] sm:$0xff] %v1222_v0  ;;  %96 = vst [vmem:[#allocation2 + $0x68] sm:$0xff] %v1222_v0  ;;  %880 = vmatprep.subr.bf16.mxu1 (!%p788_p4), %v1082_v7  ;;  %912 = vmatprep.subr.bf16.mxu0 (!%p788_p4), %v1083_v8  ;;  %v1087_v13 = vld [vmem:[#allocation8 + $0x18] sm:$0xff] (!%p788_p4)   ;;  %v1077_v14 = vld [vmem:[#allocation5 + $0x28] sm:$0xff] (!%p788_p4)  }
  0x52   :  { %97 = vst [vmem:[#allocation2 + $0x70] sm:$0xff] %v1222_v0  ;;  %98 = vst [vmem:[#allocation2 + $0x78] sm:$0xff] %v1222_v0  ;;  %v1088_v15 = vld [vmem:[#allocation10 + $0x20] sm:$0xff] (!%p788_p4)   ;;  %v1078_v17 = vld [vmem:[#allocation5 + $0x30] sm:$0xff] (!%p788_p4)  }
  0x53   :  { %881 = vmatpush3.bf16.msra.mxu1 %v1082_v7  ;;  %v1089_v16 = vld [vmem:[#allocation8 + $0x20] sm:$0xff]   ;;  %v1090_v18 = vld [vmem:[#allocation10 + $0x28] sm:$0xff]   ;;  %v1079_v20 = vld [vmem:[#allocation5 + $0x38] sm:$0xff]  }
  0x54   :  { %226 = vxpose.xlu0.c.b16.cont [3/8] %v1074_v3, 128  ;;  %913 = vmatpush3.bf16.msra.mxu0 %v1083_v8  ;;  %v1091_v19 = vld [vmem:[#allocation8 + $0x28] sm:$0xff]   ;;  %v1092_v21 = vld [vmem:[#allocation10 + $0x30] sm:$0xff]   ;;  %v1094_v23 = vld [vmem:[#allocation10 + $0x38] sm:$0xff]  }
  0x55   :  { %882 = vmatprep.subr.bf16.mxu1 %v1084_v9  ;;  %914 = vmatprep.subr.bf16.mxu0 %v1085_v10  ;;  %v1093_v22 = vld [vmem:[#allocation8 + $0x30] sm:$0xff]   ;;  %v1095_v24 = vld [vmem:[#allocation8 + $0x38] sm:$0xff]   ;;  %v160_v38 = vld [vmem:[#allocation2] sm:$0xff] }
  0x56   :  { %v162_v34 = vld [vmem:[#allocation2 + $0x10] sm:$0xff]  ;;  %v163_v42 = vld [vmem:[#allocation2 + $0x18] sm:$0xff]  ;;  %v161_v47 = vld [vmem:[#allocation2 + $0x8] sm:$0xff] }
  0x57   :  { %883 = vmatpush3.bf16.msra.mxu1 %v1084_v9  ;;  %v166_v54 = vld [vmem:[#allocation2 + $0x30] sm:$0xff]  ;;  %v164_v58 = vld [vmem:[#allocation2 + $0x20] sm:$0xff]  ;;  %v167_v62 = vld [vmem:[#allocation2 + $0x38] sm:$0xff] }
  0x58   :  { %227 = vxpose.xlu0.c.b16.cont [4/8] %v1075_v4, 128  ;;  %915 = vmatpush3.bf16.msra.mxu0 %v1085_v10  ;;  %v165_v3 = vld [vmem:[#allocation2 + $0x28] sm:$0xff]  ;;  %v170_v10 = vld [vmem:[#allocation2 + $0x50] sm:$0xff] }
  0x59   :  { %884 = vmatprep.subr.bf16.mxu1 %v1086_v12  ;;  %916 = vmatprep.subr.bf16.mxu0 %v1087_v13 }
  0x5b   :  { %885 = vmatpush3.bf16.msra.mxu1 %v1086_v12 }
  0x5c   :  { %228 = vxpose.xlu0.c.b16.cont [5/8] %v1076_v11, 128  ;;  %917 = vmatpush3.bf16.msra.mxu0 %v1087_v13 }
  0x5d   :  { %886 = vmatprep.subr.bf16.mxu1 %v1088_v15  ;;  %918 = vmatprep.subr.bf16.mxu0 %v1089_v16 }
  0x5f   :  { %887 = vmatpush3.bf16.msra.mxu1 %v1088_v15 }
  0x60   :  { %229 = vxpose.xlu0.c.b16.cont [6/8] %v1077_v14, 128  ;;  %919 = vmatpush3.bf16.msra.mxu0 %v1089_v16  ;;  %v168_v14 = vld [vmem:[#allocation2 + $0x40] sm:$0xff] }
  0x61   :  { %888 = vmatprep.subr.bf16.mxu1 %v1090_v18  ;;  %920 = vmatprep.subr.bf16.mxu0 %v1091_v19 }
  0x63   :  { %889 = vmatpush3.bf16.msra.mxu1 %v1090_v18  ;;  %v171_v18 = vld [vmem:[#allocation2 + $0x58] sm:$0xff] }
  0x64   :  { %230 = vxpose.xlu0.c.b16.cont [7/8] %v1078_v17, 128  ;;  %921 = vmatpush3.bf16.msra.mxu0 %v1091_v19 }
  0x65   :  { %890 = vmatprep.subr.bf16.mxu1 %v1092_v21  ;;  %922 = vmatprep.subr.bf16.mxu0 %v1093_v22 }
  0x67   :  { %891 = vmatpush3.bf16.msra.mxu1 %v1092_v21 }
  0x68   :  { %231 = vxpose.xlu0.c.b16.end [8/8] %v1079_v20, 128  ;;  %923 = vmatpush3.bf16.msra.mxu0 %v1093_v22 }
  0x69   :  { %892 = vmatprep.subr.bf16.mxu1 %v1094_v23  ;;  %924 = vmatprep.subr.bf16.mxu0 %v1095_v24 }
  0x6b   :  { %893 = vmatpush3.bf16.msra.mxu1 %v1094_v23  ;;  %v169_v23 = vld [vmem:[#allocation2 + $0x48] sm:$0xff] }
  0x6c   :  { %925 = vmatpush3.bf16.msra.mxu0 %v1095_v24 }
  0xb2   :  { %v232_v25 = vpop.trf.xlu0 }
  0xb3   :  { %894 = vmatprep.mubr.bf16.mxu1 %v232_v25  ;;  %926 = vmatprep.mubr.bf16.mxu0 %v232_v25 }
  0xb6   :  { %v233_v26 = vpop.trf.xlu0 }
  0xb7   :  { %895 = vmatmul.mubr.bf16.vlgmr.msra.gmra.mrb[0].mxu1 %v233_v26  ;;  %927 = vmatmul.mubr.bf16.vlgmr.msra.gmra.mrb[0].mxu0 %v233_v26 }
  0xba   :  { %v234_v27 = vpop.trf.xlu0 }
  0xbb   :  { %898 = vmatprep.mubr.bf16.mxu1 %v234_v27  ;;  %930 = vmatprep.mubr.bf16.mxu0 %v234_v27 }
  0xbe   :  { %v235_v28 = vpop.trf.xlu0 }
  0xbf   :  { %899 = vmatmul.mubr.bf16.gmra.mrb[4].mxu1 %v235_v28  ;;  %931 = vmatmul.mubr.bf16.gmra.mrb[4].mxu0 %v235_v28 }
  0xc2   :  { %v236_v29 = vpop.trf.xlu0 }
  0xc3   :  { %902 = vmatprep.mubr.bf16.mxu1 %v236_v29  ;;  %934 = vmatprep.mubr.bf16.mxu0 %v236_v29 }
  0xc6   :  { %v237_v30 = vpop.trf.xlu0 }
  0xc7   :  { %903 = vmatmul.mubr.bf16.gmra.mrb[8].mxu1 %v237_v30  ;;  %935 = vmatmul.mubr.bf16.gmra.mrb[8].mxu0 %v237_v30  ;;  %v174_v30 = vld [vmem:[#allocation2 + $0x70] sm:$0xff] }
  0xca   :  { %v238_v31 = vpop.trf.xlu0 }
  0xcb   :  { %906 = vmatprep.mubr.bf16.mxu1 %v238_v31  ;;  %938 = vmatprep.mubr.bf16.mxu0 %v238_v31 }
  0xce   :  { %v239_v32 = vpop.trf.xlu0 }
  0xcf   :  { %907 = vmatmul.mubr.bf16.gmra.mrb[12].mxu1 %v239_v32  ;;  %939 = vmatmul.mubr.bf16.gmra.mrb[12].mxu0 %v239_v32 }
 0x18a   :  { %v896_v33 = vpop.f32.mrb[0].mxu1  ;;  %v928_v35 = vpop.f32.mrb[0].mxu0 }
 0x18b   :  { %v476_v36 = vadd.f32 %v928_v35, %v896_v33  ;;  %v322_v37 = vpop.f32.mrb[1].mxu1  ;;  %v467_v39 = vpop.f32.mrb[1].mxu0 }
 0x18c   :  { %v468_v40 = vadd.f32 %v467_v39, %v322_v37  ;;  %v897_v41 = vpop.f32.mrb[2].mxu1  ;;  %v929_v43 = vpop.f32.mrb[2].mxu0 }
 0x18d   :  { %v532_v44 = vadd.f32 %v476_v36, %v162_v34  ;;  %v479_v45 = vadd.f32 %v929_v43, %v897_v41  ;;  %v325_v46 = vpop.f32.mrb[3].mxu1  ;;  %v470_v48 = vpop.f32.mrb[3].mxu0  ;;  %v172_v34 = vld [vmem:[#allocation2 + $0x60] sm:$0xff]  ;;  %v173_v43 = vld [vmem:[#allocation2 + $0x68] sm:$0xff] }
 0x18e   :  { %v530_v49 = vadd.f32 %v468_v40, %v160_v38  ;;  %v471_v50 = vadd.f32 %v470_v48, %v325_v46  ;;  %v175_v38 = vld [vmem:[#allocation2 + $0x78] sm:$0xff] }
 0x18f   :  { %548 = vst [vmem:[#allocation2 + $0x10] sm:$0xff] %v532_v44  ;;  %v533_v51 = vadd.f32 %v479_v45, %v163_v42 }
 0x190   :  { %546 = vst [vmem:[#allocation2] sm:$0xff] %v530_v49  ;;  %v531_v52 = vadd.f32 %v471_v50, %v161_v47 }
 0x191   :  { %549 = vst [vmem:[#allocation2 + $0x18] sm:$0xff] %v533_v51 }
 0x192   :  { %547 = vst [vmem:[#allocation2 + $0x8] sm:$0xff] %v531_v52  ;;  %v900_v53 = vpop.f32.mrb[4].mxu1  ;;  %v932_v55 = vpop.f32.mrb[4].mxu0 }
 0x193   :  { %v492_v56 = vadd.f32 %v932_v55, %v900_v53  ;;  %v338_v57 = vpop.f32.mrb[5].mxu1  ;;  %v483_v59 = vpop.f32.mrb[5].mxu0 }
 0x194   :  { %v484_v60 = vadd.f32 %v483_v59, %v338_v57  ;;  %v901_v61 = vpop.f32.mrb[6].mxu1  ;;  %v933_v63 = vpop.f32.mrb[6].mxu0 }
 0x195   :  { %v536_v0 = vadd.f32 %v492_v56, %v166_v54  ;;  %v495_v1 = vadd.f32 %v933_v63, %v901_v61  ;;  %v341_v2 = vpop.f32.mrb[7].mxu1  ;;  %v486_v4 = vpop.f32.mrb[7].mxu0 }
 0x196   :  { %v534_v5 = vadd.f32 %v484_v60, %v164_v58  ;;  %v487_v6 = vadd.f32 %v486_v4, %v341_v2 }
 0x197   :  { %552 = vst [vmem:[#allocation2 + $0x30] sm:$0xff] %v536_v0  ;;  %v537_v7 = vadd.f32 %v495_v1, %v167_v62 }
 0x198   :  { %550 = vst [vmem:[#allocation2 + $0x20] sm:$0xff] %v534_v5  ;;  %v535_v8 = vadd.f32 %v487_v6, %v165_v3 }
 0x199   :  { %553 = vst [vmem:[#allocation2 + $0x38] sm:$0xff] %v537_v7 }
 0x19a   :  { %551 = vst [vmem:[#allocation2 + $0x28] sm:$0xff] %v535_v8  ;;  %v904_v9 = vpop.f32.mrb[8].mxu1  ;;  %v936_v11 = vpop.f32.mrb[8].mxu0 }
 0x19b   :  { %v508_v12 = vadd.f32 %v936_v11, %v904_v9  ;;  %v354_v13 = vpop.f32.mrb[9].mxu1  ;;  %v499_v15 = vpop.f32.mrb[9].mxu0 }
 0x19c   :  { %v500_v16 = vadd.f32 %v499_v15, %v354_v13  ;;  %v905_v17 = vpop.f32.mrb[10].mxu1  ;;  %v937_v19 = vpop.f32.mrb[10].mxu0 }
 0x19d   :  { %v540_v20 = vadd.f32 %v508_v12, %v170_v10  ;;  %v511_v21 = vadd.f32 %v937_v19, %v905_v17  ;;  %v357_v22 = vpop.f32.mrb[11].mxu1  ;;  %v502_v24 = vpop.f32.mrb[11].mxu0 }
 0x19e   :  { %v538_v25 = vadd.f32 %v500_v16, %v168_v14  ;;  %v503_v26 = vadd.f32 %v502_v24, %v357_v22 }
 0x19f   :  { %556 = vst [vmem:[#allocation2 + $0x50] sm:$0xff] %v540_v20  ;;  %v541_v27 = vadd.f32 %v511_v21, %v171_v18 }
 0x1a0   :  { %554 = vst [vmem:[#allocation2 + $0x40] sm:$0xff] %v538_v25  ;;  %v539_v28 = vadd.f32 %v503_v26, %v169_v23 }
 0x1a1   :  { %557 = vst [vmem:[#allocation2 + $0x58] sm:$0xff] %v541_v27 }
 0x1a2   :  { %555 = vst [vmem:[#allocation2 + $0x48] sm:$0xff] %v539_v28  ;;  %v908_v29 = vpop.f32.mrb[12].mxu1  ;;  %v940_v31 = vpop.f32.mrb[12].mxu0 }
 0x1a3   :  { %v524_v32 = vadd.f32 %v940_v31, %v908_v29  ;;  %v370_v33 = vpop.f32.mrb[13].mxu1  ;;  %v515_v35 = vpop.f32.mrb[13].mxu0 }
 0x1a4   :  { %v516_v36 = vadd.f32 %v515_v35, %v370_v33  ;;  %v909_v37 = vpop.f32.mrb[14].mxu1  ;;  %v941_v39 = vpop.f32.mrb[14].mxu0 }
 0x1a5   :  { %v544_v40 = vadd.f32 %v524_v32, %v174_v30  ;;  %v527_v41 = vadd.f32 %v941_v39, %v909_v37  ;;  %v373_v42 = vpop.f32.mrb[15].mxu1  ;;  %v518_v44 = vpop.f32.mrb[15].mxu0 }
 0x1a6   :  { %v542_v45 = vadd.f32 %v516_v36, %v172_v34  ;;  %v519_v46 = vadd.f32 %v518_v44, %v373_v42 }
 0x1a7   :  { %560 = vst [vmem:[#allocation2 + $0x70] sm:$0xff] %v544_v40  ;;  %v545_v47 = vadd.f32 %v527_v41, %v175_v38 }
 0x1a8   :  { %558 = vst [vmem:[#allocation2 + $0x60] sm:$0xff] %v542_v45  ;;  %v543_v48 = vadd.f32 %v519_v46, %v173_v43 }
 0x1a9   :  { %561 = vst [vmem:[#allocation2 + $0x78] sm:$0xff] %v545_v47 }
 0x1aa   :  { %559 = vst [vmem:[#allocation2 + $0x68] sm:$0xff] %v543_v48 }
 0x1ab PF:  { %v581_v49 = vld [vmem:[#allocation11] sm:$0xff]  ;;  %v582_v50 = vld [vmem:[#allocation11 + $0x8] sm:$0xff]  ;;  %v583_v51 = vld [vmem:[#allocation11 + $0x10] sm:$0xff] }
 0x1ac   :  { %v998_v52 = vpack.c.bf16 %v582_v50, %v581_v49  ;;  %v584_v53 = vld [vmem:[#allocation11 + $0x18] sm:$0xff]  ;;  %v585_v55 = vld [vmem:[#allocation11 + $0x20] sm:$0xff]  ;;  %v586_v56 = vld [vmem:[#allocation11 + $0x28] sm:$0xff] }
 0x1ad   :  { %v1002_v54 = vpack.c.bf16 %v584_v53, %v583_v51  ;;  %v1006_v57 = vpack.c.bf16 %v586_v56, %v585_v55  ;;  %v565_v58 = vld [vmem:[#allocation2] sm:$0xff]  ;;  %v587_v60 = vld [vmem:[#allocation11 + $0x30] sm:$0xff]  ;;  %v588_v61 = vld [vmem:[#allocation11 + $0x38] sm:$0xff] }
 0x1ae   :  { %999 = vmatprep.subr.bf16.mxu0 %v998_v52  ;;  %1046 = vmatprep.subr.bf16.mxu1 %v998_v52  ;;  %v573_v59 = vld [vmem:[#allocation2 + $0x40] sm:$0xff]  ;;  %v1010_v62 = vpack.c.bf16 %v588_v61, %v587_v60  ;;  %v590_v0 = vld [vmem:[#allocation11 + $0x48] sm:$0xff]  ;;  %v591_v2 = vld [vmem:[#allocation11 + $0x50] sm:$0xff] }
 0x1af   :  { %1001 = vmatpush3.bf16.msra.mxu0 %v998_v52  ;;  %1054 = vmatpush3.bf16.msra.mxu1 %v998_v52  ;;  %v589_v63 = vld [vmem:[#allocation11 + $0x40] sm:$0xff]  ;;  %v592_v3 = vld [vmem:[#allocation11 + $0x58] sm:$0xff]  ;;  %v594_v6 = vld [vmem:[#allocation11 + $0x68] sm:$0xff] }
 0x1b0   :  { %1003 = vmatprep.subr.bf16.mxu0 %v1002_v54  ;;  %1047 = vmatprep.subr.bf16.mxu1 %v1002_v54  ;;  %v1014_v1 = vpack.c.bf16 %v590_v0, %v589_v63  ;;  %v1018_v4 = vpack.c.bf16 %v592_v3, %v591_v2  ;;  %v593_v5 = vld [vmem:[#allocation11 + $0x60] sm:$0xff]  ;;  %v595_v8 = vld [vmem:[#allocation11 + $0x70] sm:$0xff]  ;;  %v596_v9 = vld [vmem:[#allocation11 + $0x78] sm:$0xff] }
 0x1b1   :  { %974 = vmatprep.mubr.f32.mxu0 %v565_v58  ;;  %986 = vmatprep.mubr.f32.mxu1 %v573_v59  ;;  %v1022_v7 = vpack.c.bf16 %v594_v6, %v593_v5  ;;  %v1026_v10 = vpack.c.bf16 %v596_v9, %v595_v8  ;;  %v566_v11 = vld [vmem:[#allocation2 + $0x8] sm:$0xff]  ;;  %v567_v13 = vld [vmem:[#allocation2 + $0x10] sm:$0xff]  ;;  %v568_v15 = vld [vmem:[#allocation2 + $0x18] sm:$0xff] }
 0x1b2   :  { %v574_v12 = vld [vmem:[#allocation2 + $0x48] sm:$0xff]  ;;  %v575_v14 = vld [vmem:[#allocation2 + $0x50] sm:$0xff]  ;;  %v576_v16 = vld [vmem:[#allocation2 + $0x58] sm:$0xff] }
 0x1b3   :  { %1005 = vmatpush3.bf16.msra.mxu0 %v1002_v54  ;;  %1055 = vmatpush3.bf16.msra.mxu1 %v1002_v54  ;;  %v569_v17 = vld [vmem:[#allocation2 + $0x20] sm:$0xff]  ;;  %v570_v19 = vld [vmem:[#allocation2 + $0x28] sm:$0xff]  ;;  %v571_v21 = vld [vmem:[#allocation2 + $0x30] sm:$0xff] }
 0x1b4   :  { %1007 = vmatprep.subr.bf16.mxu0 %v1006_v57  ;;  %1048 = vmatprep.subr.bf16.mxu1 %v1006_v57  ;;  %v577_v18 = vld [vmem:[#allocation2 + $0x60] sm:$0xff]  ;;  %v578_v20 = vld [vmem:[#allocation2 + $0x68] sm:$0xff]  ;;  %v579_v22 = vld [vmem:[#allocation2 + $0x70] sm:$0xff] }
 0x1b5   :  { %v572_v23 = vld [vmem:[#allocation2 + $0x38] sm:$0xff]  ;;  %v813_v25 = vld [vmem:[%s1359_s5] ss:$0 sm:$0xff]  ;;  %s1223_s5 = smov [#allocation13]  }
 0x1b6   :  { %v580_v24 = vld [vmem:[#allocation2 + $0x78] sm:$0xff]  ;;  %s770_s23 = sshll.u32 %s1223_s5, 4  ;;  %s771_s23 = int_to_ptr.vmem [resolvable:$true] %s770_s23 }
 0x1b7   :  { %1009 = vmatpush3.bf16.msra.mxu0 %v1006_v57  ;;  %1056 = vmatpush3.bf16.msra.mxu1 %v1006_v57  ;;  %s1184_s25 = scalar_lea.vmem %s771_s23, 2048  ;;  %p1189_p6 = scmp.lt.s32.totalorder %s771_s23, %s771_s23 }
 0x1b8   :  { %1011 = vmatprep.subr.bf16.mxu0 %v1010_v62  ;;  %1049 = vmatprep.subr.bf16.mxu1 %v1010_v62  ;;  %p1185_p5 = scmp.ne.s32.totalorder %s771_s23, %s1184_s25  ;;  %p1190_p7 = scmp.lt.s32.totalorder %s1184_s25, %s1184_s25 }
 0x1ba   :  { %p1191_p8 = por %p1190_p7, %p1189_p6 }
 0x1bb   :  { %1013 = vmatpush3.bf16.msra.mxu0 %v1010_v62  ;;  %1057 = vmatpush3.bf16.msra.mxu1 %v1010_v62 }
 0x1bc   :  { %1015 = vmatprep.subr.bf16.mxu0 %v1014_v1  ;;  %1050 = vmatprep.subr.bf16.mxu1 %v1014_v1  ;;  %p1192_p9 = pnand %p1191_p8, %p1185_p5 }
 0x1bf   :  { %1017 = vmatpush3.bf16.msra.mxu0 %v1014_v1  ;;  %1058 = vmatpush3.bf16.msra.mxu1 %v1014_v1 }
 0x1c0   :  { %1019 = vmatprep.subr.bf16.mxu0 %v1018_v4  ;;  %1051 = vmatprep.subr.bf16.mxu1 %v1018_v4 }
 0x1c3   :  { %1021 = vmatpush3.bf16.msra.mxu0 %v1018_v4  ;;  %1059 = vmatpush3.bf16.msra.mxu1 %v1018_v4 }
 0x1c4   :  { %1023 = vmatprep.subr.bf16.mxu0 %v1022_v7  ;;  %1052 = vmatprep.subr.bf16.mxu1 %v1022_v7 }
 0x1c7   :  { %1025 = vmatpush3.bf16.msra.mxu0 %v1022_v7  ;;  %1060 = vmatpush3.bf16.msra.mxu1 %v1022_v7 }
 0x1c8   :  { %1027 = vmatprep.subr.bf16.mxu0 %v1026_v10  ;;  %1053 = vmatprep.subr.bf16.mxu1 %v1026_v10 }
 0x1cb   :  { %1029 = vmatpush3.bf16.msra.mxu0 %v1026_v10  ;;  %1061 = vmatpush3.bf16.msra.mxu1 %v1026_v10 }
 0x1ce   :  { %975 = vmatmul.mubr.f32.vlgmr.msra.gmra.mrb[0].mxu0 %v566_v11  ;;  %987 = vmatmul.mubr.f32.vlgmr.msra.gmra.mrb[0].mxu1 %v574_v12 }
 0x1cf   :  { %977 = vmatprep.mubr.f32.mxu0 %v567_v13  ;;  %989 = vmatprep.mubr.f32.mxu1 %v575_v14 }
 0x1d2   :  { %978 = vmatmul.mubr.f32.gmra.mrb[2].mxu0 %v568_v15  ;;  %990 = vmatmul.mubr.f32.gmra.mrb[2].mxu1 %v576_v16 }
 0x1d3   :  { %980 = vmatprep.mubr.f32.mxu0 %v569_v17  ;;  %992 = vmatprep.mubr.f32.mxu1 %v577_v18 }
 0x1d6   :  { %981 = vmatmul.mubr.f32.gmra.mrb[4].mxu0 %v570_v19  ;;  %993 = vmatmul.mubr.f32.gmra.mrb[4].mxu1 %v578_v20 }
 0x1d7   :  { %983 = vmatprep.mubr.f32.mxu0 %v571_v21  ;;  %995 = vmatprep.mubr.f32.mxu1 %v579_v22 }
 0x1da   :  { %984 = vmatmul.mubr.f32.gmra.mrb[6].mxu0 %v572_v23  ;;  %996 = vmatmul.mubr.f32.gmra.mrb[6].mxu1 %v580_v24 }
 0x2a1   :  { %v976_v26 = vpop.f32.mrb[0].mxu0  ;;  %v988_v27 = vpop.f32.mrb[0].mxu1 }
 0x2a2   :  { %v676_v28 = vadd.f32 %v976_v26, %v813_v25  ;;  %v716_v29 = vadd.f32 %v988_v27, %v813_v25  ;;  %v670_v30 = vpop.f32.mrb[1].mxu0  ;;  %v710_v31 = vpop.f32.mrb[1].mxu1 }
 0x2a3   :  { %v671_v32 = vadd.f32 %v813_v25, %v670_v30  ;;  %v711_v33 = vadd.f32 %v813_v25, %v710_v31 }
 0x2a4   :  { %750 = vst [vmem:[#allocation13 + $0x8] sm:$0xff] %v676_v28  ;;  %758 = vst [vmem:[#allocation13 + $0x48] sm:$0xff] %v716_v29 }
 0x2a5   :  { %749 = vst [vmem:[#allocation13] sm:$0xff] %v671_v32  ;;  %757 = vst [vmem:[#allocation13 + $0x40] sm:$0xff] %v711_v33  ;;  %v979_v34 = vpop.f32.mrb[2].mxu0  ;;  %v991_v35 = vpop.f32.mrb[2].mxu1 }
 0x2a6   :  { %v686_v36 = vadd.f32 %v979_v34, %v813_v25  ;;  %v726_v37 = vadd.f32 %v991_v35, %v813_v25  ;;  %v680_v38 = vpop.f32.mrb[3].mxu0  ;;  %v720_v39 = vpop.f32.mrb[3].mxu1 }
 0x2a7   :  { %v681_v40 = vadd.f32 %v813_v25, %v680_v38  ;;  %v721_v41 = vadd.f32 %v813_v25, %v720_v39 }
 0x2a8   :  { %752 = vst [vmem:[#allocation13 + $0x18] sm:$0xff] %v686_v36  ;;  %760 = vst [vmem:[#allocation13 + $0x58] sm:$0xff] %v726_v37 }
 0x2a9   :  { %751 = vst [vmem:[#allocation13 + $0x10] sm:$0xff] %v681_v40  ;;  %759 = vst [vmem:[#allocation13 + $0x50] sm:$0xff] %v721_v41  ;;  %v982_v42 = vpop.f32.mrb[4].mxu0  ;;  %v994_v43 = vpop.f32.mrb[4].mxu1 }
 0x2aa   :  { %v696_v44 = vadd.f32 %v982_v42, %v813_v25  ;;  %v736_v45 = vadd.f32 %v994_v43, %v813_v25  ;;  %v690_v46 = vpop.f32.mrb[5].mxu0  ;;  %v730_v47 = vpop.f32.mrb[5].mxu1 }
 0x2ab   :  { %v691_v48 = vadd.f32 %v813_v25, %v690_v46  ;;  %v731_v49 = vadd.f32 %v813_v25, %v730_v47 }
 0x2ac   :  { %754 = vst [vmem:[#allocation13 + $0x28] sm:$0xff] %v696_v44  ;;  %762 = vst [vmem:[#allocation13 + $0x68] sm:$0xff] %v736_v45 }
 0x2ad   :  { %753 = vst [vmem:[#allocation13 + $0x20] sm:$0xff] %v691_v48  ;;  %761 = vst [vmem:[#allocation13 + $0x60] sm:$0xff] %v731_v49  ;;  %v985_v50 = vpop.f32.mrb[6].mxu0  ;;  %v997_v51 = vpop.f32.mrb[6].mxu1 }
 0x2ae   :  { %v706_v52 = vadd.f32 %v985_v50, %v813_v25  ;;  %v746_v53 = vadd.f32 %v997_v51, %v813_v25  ;;  %v700_v54 = vpop.f32.mrb[7].mxu0  ;;  %v740_v55 = vpop.f32.mrb[7].mxu1 }
 0x2af   :  { %v701_v56 = vadd.f32 %v813_v25, %v700_v54  ;;  %v741_v57 = vadd.f32 %v813_v25, %v740_v55 }
 0x2b0   :  { %756 = vst [vmem:[#allocation13 + $0x38] sm:$0xff] %v706_v52  ;;  %764 = vst [vmem:[#allocation13 + $0x78] sm:$0xff] %v746_v53 }
 0x2b1   :  { %755 = vst [vmem:[#allocation13 + $0x30] sm:$0xff] %v701_v56  ;;  %763 = vst [vmem:[#allocation13 + $0x70] sm:$0xff] %v741_v57 }
 0x2b2   :  { %1195 = shalt.err (!%p1192_p9)
}
 0x2b3   :  { %s1196_s28 = scalar_lea.hbm %s1360_s6, 2048 }
 0x2b4   :  { %p1197_p10 = scmp.ne.s32.totalorder %s1360_s6, %s1196_s28  ;;  %p1200_p11 = scmp.lt.u32.totalorder %s1196_s28, %s1360_s6 }
 0x2b6   :  { %p1202_p12 = pnand %p1200_p11, %p1197_p10 }
 0x2b8   :  { %1205 = shalt.err (!%p1202_p12)
}
 0x2b9   :  { %776 = dma.vmem_to_hbm [thread:$0]  %s771_s23, 2048, %s1360_s6, [#allocation7], %s1220_s3, %s1220_s3, %s1221_s9  }
 0x2ba   :  { %1212 = dma.done.wait [#allocation7], 2048  }
 0x2bb   :  { %1213 = vsyncadd [#allocation7], 4294965248 }
 0x2bc   :  { %780 = vsyncpa [#allocation6], 1 }
 0x2bd   :  { %781 = vsyncpa [#allocation9], 1 }
 0x2be   :  { %782 = vsyncpa [#allocation12], 1 }
 0x2bf   :  { %783 = vsyncpa [#allocation7], 1 }

</bundles_post_ra>
